<compile_context>
chip_gen: v6e
topology: v6e:2x2x1
jax: 0.10.0
libtpu: 0.0.40
codegen_flags: <defaults>
</compile_context>

<pallas_src>
import functools

import jax
import jax.numpy as jnp
from jax import lax
from jax.experimental import pallas as pl
from jax.experimental.pallas import tpu as pltpu


def _round_up(x, m):
    return ((x + m - 1) // m) * m


def _cdiv(a, b):
    return (a + b - 1) // b


def _radio_encoder_kernel(patches_ref, wp_ref, bp_ref,
                          w1_ref, b1_ref, w2_ref, b2_ref,
                          gamma_ref, beta_ref, out_ref,
                          *, proj_valid, approx_gelu):
    f32 = jnp.float32

    # --- synthetic "pretrained encoder": patch embedding -> last_hidden_state
    h = jnp.dot(patches_ref[...], wp_ref[...],
                preferred_element_type=f32) + bp_ref[...]

    # --- AlignmentLayer ---
    # linear_layer1 (bf16 operands, f32 accumulation)
    x = jnp.dot(h.astype(w1_ref.dtype), w1_ref[...],
                preferred_element_type=f32) + b1_ref[...]
    if approx_gelu:
        x = jax.nn.gelu(x, approximate=True)          # tanh path -> EUP slot
    else:
        # exact (erf-based) GELU, matching torch.nn.GELU() default numerics
        x = 0.5 * x * (1.0 + lax.erf(x * 0.7071067811865476))
    # linear_layer2
    x = jnp.dot(x.astype(w2_ref.dtype), w2_ref[...],
                preferred_element_type=f32) + b2_ref[...]
    # dropout: eval-mode identity (inference semantics)

    # LayerNorm over the *valid* projection lanes only.  When proj is already
    # lane-aligned the mask is statically elided.
    proj_pad = out_ref.shape[-1]
    if proj_valid == proj_pad:
        mean = jnp.mean(x, axis=-1, keepdims=True)
        centered = x - mean
        var = jnp.mean(centered * centered, axis=-1, keepdims=True)
    else:
        lane = lax.broadcasted_iota(jnp.int32, (1, proj_pad), 1)
        mask = (lane < proj_valid).astype(f32)
        inv_n = 1.0 / float(proj_valid)
        mean = jnp.sum(x * mask, axis=-1, keepdims=True) * inv_n
        centered = (x - mean) * mask
        var = jnp.sum(centered * centered, axis=-1, keepdims=True) * inv_n
    xhat = centered * lax.rsqrt(var + 1e-5)
    # gamma/beta padding lanes are zero, so padded output lanes stay zero.
    out_ref[...] = (xhat * gamma_ref[...] + beta_ref[...]).astype(out_ref.dtype)


def prepare_params(params, *, compute_dtype=jnp.bfloat16):
    """Pad params lane-dense (128) and cast matmul weights to the MXU dtype.

    Done ONCE, outside the per-call forward, so no per-step HBM churn.
    Padding is a no-op for dims already 128-aligned.
    """
    wp, bp, w1, b1, w2, b2, gamma, beta = params
    patch_dim, hidden = wp.shape
    proj = w2.shape[1]
    pd_pad = _round_up(patch_dim, 128)
    hid_pad = _round_up(hidden, 128)
    proj_pad = _round_up(proj, 128)

    def pad2(a, r, c):
        if a.shape == (r, c):
            return a
        return jnp.pad(a, ((0, r - a.shape[0]), (0, c - a.shape[1])))

    return dict(
        wp=pad2(wp, pd_pad, hid_pad).astype(compute_dtype),
        bp=pad2(bp, 1, hid_pad).astype(jnp.float32),
        w1=pad2(w1, hid_pad, proj_pad).astype(compute_dtype),
        b1=pad2(b1, 1, proj_pad).astype(jnp.float32),
        w2=pad2(w2, proj_pad, proj_pad).astype(compute_dtype),
        b2=pad2(b2, 1, proj_pad).astype(jnp.float32),
        gamma=pad2(gamma, 1, proj_pad).astype(jnp.float32),
        beta=pad2(beta, 1, proj_pad).astype(jnp.float32),
        dims=(patch_dim, hidden, proj, pd_pad, hid_pad, proj_pad),
    )


def radio_encoder_forward(x_nchw, prepped, *, patch=8, tm_max=1024,
                          approx_gelu=False):
    """x_nchw: [B, C, H, W] float32. Returns [B, N_tokens, projection_dim]."""
    B, C, H, W = x_nchw.shape
    ph, pw = H // patch, W // patch
    n_tok = ph * pw
    rows = B * n_tok
    patch_dim, hidden, proj, pd_pad, hid_pad, proj_pad = prepped["dims"]
    assert patch_dim == C * patch * patch
    compute_dtype = prepped["wp"].dtype
    act_bytes = jnp.dtype(compute_dtype).itemsize

    # Patch extraction (== conv2d with kernel=stride=patch), tokens-major slab.
    # TODO(synk): folding this gather into the kernel's index_map (gridding
    # over (b, ph) windows of x_nchw) would remove one HBM round-trip.
    p = x_nchw.reshape(B, C, ph, patch, pw, patch).transpose(0, 2, 4, 1, 3, 5)
    patches = p.reshape(rows, patch_dim).astype(compute_dtype)

    # --- device-aware VMEM budget / row-tile sizing ---
    try:
        vmem_cap = int(pltpu.get_tpu_info().vmem_capacity_bytes)
    except Exception:
        vmem_cap = 64 << 20                     # conservative (v7x) fallback
    vmem_limit = min(vmem_cap * 3 // 4, 100 << 20)

    weight_vmem = ((pd_pad * hid_pad + hid_pad * proj_pad + proj_pad * proj_pad)
                   * act_bytes + (hid_pad + 3 * proj_pad) * 4)
    per_row_vmem = (2 * pd_pad * act_bytes       # double-buffered input tile
                    + 2 * proj_pad * 4           # double-buffered output tile
                    + 3 * hid_pad * 4            # h + temps (f32)
                    + 4 * proj_pad * 4)          # x + GELU/LN temps (f32)
    budget = int(vmem_limit * 0.6) - weight_vmem
    tm_cap = max(8, min(tm_max, max(8, budget // per_row_vmem) // 8 * 8))
    tm_cap = min(tm_cap, _round_up(rows, 8))

    n_tiles = _cdiv(rows, tm_cap)
    if n_tiles < 2 and rows > 8:
        n_tiles = 2                              # keep both v7x TCs busy
    tm = _round_up(_cdiv(rows, n_tiles), 8)      # minimal row padding
    rows_pad = tm * n_tiles

    if patches.shape != (rows_pad, pd_pad):
        patches = jnp.pad(patches,
                          ((0, rows_pad - rows), (0, pd_pad - patch_dim)))

    flops = 2 * rows_pad * (pd_pad * hid_pad + hid_pad * proj_pad
                            + proj_pad * proj_pad)
    bytes_accessed = (rows_pad * pd_pad * act_bytes + weight_vmem
                      + rows_pad * proj_pad * 4)
    cost = pl.CostEstimate(flops=flops,
                           transcendentals=rows_pad * proj_pad,
                           bytes_accessed=bytes_accessed)

    kernel = functools.partial(_radio_encoder_kernel, proj_valid=proj,
                               approx_gelu=approx_gelu)

    def make_call(weight_pipeline_mode):
        kw = {}
        if weight_pipeline_mode is not None:
            kw["pipeline_mode"] = weight_pipeline_mode

        def wspec(shape):                        # grid-invariant operand
            return pl.BlockSpec(shape, lambda i: (0, 0), **kw)

        return pl.pallas_call(
            kernel,
            out_shape=jax.ShapeDtypeStruct((rows_pad, proj_pad), jnp.float32),
            grid_spec=pltpu.PrefetchScalarGridSpec(
                num_scalar_prefetch=0,
                grid=(n_tiles,),
                in_specs=[
                    # activations: tiled along rows, double-buffered
                    pl.BlockSpec((tm, pd_pad), lambda i: (i, 0)),
                    # weights / biases: resident across all row tiles
                    wspec((pd_pad, hid_pad)),
                    wspec((1, hid_pad)),
                    wspec((hid_pad, proj_pad)),
                    wspec((1, proj_pad)),
                    wspec((proj_pad, proj_pad)),
                    wspec((1, proj_pad)),
                    wspec((1, proj_pad)),
                    wspec((1, proj_pad)),
                ],
                out_specs=pl.BlockSpec((tm, proj_pad), lambda i: (i, 0)),
            ),
            compiler_params=pltpu.CompilerParams(
                dimension_semantics=("parallel",),   # shard row tiles (v7x)
                vmem_limit_bytes=vmem_limit,
            ),
            cost_estimate=cost,
        )

    args = (patches, prepped["wp"], prepped["bp"], prepped["w1"], prepped["b1"],
            prepped["w2"], prepped["b2"], prepped["gamma"], prepped["beta"])
    try:
        # single-buffer the grid-invariant weights (halves their VMEM use)
        out = make_call(pl.Buffered(1))(*args)
    except Exception:
        out = make_call(None)(*args)

    if rows_pad != rows or proj_pad != proj:
        out = out[:rows, :proj]
    return out.reshape(B, n_tok, proj)


def init_params(key, *, patch_dim, hidden_size, projection_dim):
    """Deterministic synthetic parameters (shapes follow the module __init__)."""
    ks = jax.random.split(key, 6)
    scale_p = 1.0 / jnp.sqrt(patch_dim)
    scale_h = 1.0 / jnp.sqrt(hidden_size)
    scale_d = 1.0 / jnp.sqrt(projection_dim)
    wp = jax.random.uniform(ks[0], (patch_dim, hidden_size), jnp.float32,
                            -scale_p, scale_p)
    bp = jax.random.uniform(ks[1], (1, hidden_size), jnp.float32,
                            -scale_p, scale_p)
    w1 = jax.random.uniform(ks[2], (hidden_size, projection_dim), jnp.float32,
                            -scale_h, scale_h)
    b1 = jax.random.uniform(ks[3], (1, projection_dim), jnp.float32,
                            -scale_h, scale_h)
    w2 = jax.random.uniform(ks[4], (projection_dim, projection_dim), jnp.float32,
                            -scale_d, scale_d)
    b2 = jax.random.uniform(ks[5], (1, projection_dim), jnp.float32,
                            -scale_d, scale_d)
    gamma = jnp.ones((1, projection_dim), jnp.float32)
    beta = jnp.zeros((1, projection_dim), jnp.float32)
    return (wp, bp, w1, b1, w2, b2, gamma, beta)


def _reference(x_nchw, params, *, patch=8):
    """Pure-JAX f32 reference for correctness check."""
    B, C, H, W = x_nchw.shape
    ph, pw = H // patch, W // patch
    p = x_nchw.reshape(B, C, ph, patch, pw, patch).transpose(0, 2, 4, 1, 3, 5)
    patches = p.reshape(B * ph * pw, C * patch * patch)
    wp, bp, w1, b1, w2, b2, gamma, beta = params
    h = patches @ wp + bp
    x = h @ w1 + b1
    x = 0.5 * x * (1.0 + lax.erf(x * 0.7071067811865476))
    x = x @ w2 + b2
    mean = x.mean(-1, keepdims=True)
    var = ((x - mean) ** 2).mean(-1, keepdims=True)
    x = (x - mean) / jnp.sqrt(var + 1e-5) * gamma + beta
    return x.reshape(B, ph * pw, -1)


if __name__ == "__main__":
    B, C, H, W = 2, 4, 16, 16
    patch = 8
    hidden_size = 32       # stand-in pretrained_encoder.config.hidden_size
    projection_dim = 32    # CFG.projection_dim

    key = jax.random.PRNGKey(0)
    kx, kp = jax.random.split(key)
    x = jax.random.normal(kx, (B, C, H, W), jnp.float32)
    params = init_params(kp, patch_dim=C * patch * patch,
                         hidden_size=hidden_size,
                         projection_dim=projection_dim)

    # Pad + bf16-cast the weights ONCE (amortized across forward calls).
    prepped = prepare_params(params, compute_dtype=jnp.bfloat16)

    out = radio_encoder_forward(x, prepped, patch=patch)
    out = jax.block_until_ready(out)

    ref = _reference(x, params, patch=patch)
    assert out.shape == (B, (H // patch) * (W // patch), projection_dim)
    # bf16 matmul operands (f32 accumulation) -> loosened tolerance vs f32 ref.
    assert jnp.allclose(out, ref, atol=5e-2, rtol=1e-2), (
        float(jnp.max(jnp.abs(out - ref))))

    print("KERNEL_OK")
</pallas_src>

<mosaic_0001>
module attributes {stable_mosaic.version = 11 : i64} {
  func.func @_radio_encoder_kernel(%arg0: i32, %arg1: memref<8x256xbf16, #tpu.memory_space<vmem>>, %arg2: memref<256x128xbf16, #tpu.memory_space<vmem>>, %arg3: memref<1x128xf32, #tpu.memory_space<vmem>>, %arg4: memref<128x128xbf16, #tpu.memory_space<vmem>>, %arg5: memref<1x128xf32, #tpu.memory_space<vmem>>, %arg6: memref<128x128xbf16, #tpu.memory_space<vmem>>, %arg7: memref<1x128xf32, #tpu.memory_space<vmem>>, %arg8: memref<1x128xf32, #tpu.memory_space<vmem>>, %arg9: memref<1x128xf32, #tpu.memory_space<vmem>>, %arg10: memref<8x128xf32, #tpu.memory_space<vmem>>) attributes {dimension_semantics = [#tpu.dimension_semantics<parallel>], iteration_bounds = array<i64: 1>, scalar_prefetch = 0 : i64, scratch_operands = 0 : i64, tpu.core_type = #tpu.core_type<tc>, window_params = [{transform_indices = @transform_0, window_bounds = array<i64: 8, 256>}, {pipeline_mode = #tpu.pipeline_mode<synchronous>, transform_indices = @transform_1, window_bounds = array<i64: 256, 128>}, {pipeline_mode = #tpu.pipeline_mode<synchronous>, transform_indices = @transform_2, window_bounds = array<i64: 1, 128>}, {pipeline_mode = #tpu.pipeline_mode<synchronous>, transform_indices = @transform_3, window_bounds = array<i64: 128, 128>}, {pipeline_mode = #tpu.pipeline_mode<synchronous>, transform_indices = @transform_4, window_bounds = array<i64: 1, 128>}, {pipeline_mode = #tpu.pipeline_mode<synchronous>, transform_indices = @transform_5, window_bounds = array<i64: 128, 128>}, {pipeline_mode = #tpu.pipeline_mode<synchronous>, transform_indices = @transform_6, window_bounds = array<i64: 1, 128>}, {pipeline_mode = #tpu.pipeline_mode<synchronous>, transform_indices = @transform_7, window_bounds = array<i64: 1, 128>}, {pipeline_mode = #tpu.pipeline_mode<synchronous>, transform_indices = @transform_8, window_bounds = array<i64: 1, 128>}, {transform_indices = @transform_9, window_bounds = array<i64: 8, 128>}]} {
    %c0 = arith.constant 0 : index
    %c0_0 = arith.constant 0 : index
    %0 = vector.load %arg1[%c0, %c0_0] : memref<8x256xbf16, #tpu.memory_space<vmem>>, vector<8x256xbf16>
    %c0_1 = arith.constant 0 : index
    %c0_2 = arith.constant 0 : index
    %1 = vector.load %arg2[%c0_1, %c0_2] : memref<256x128xbf16, #tpu.memory_space<vmem>>, vector<256x128xbf16>
    %cst = arith.constant dense<0.000000e+00> : vector<8x128xf32>
    %2 = tpu.matmul %0, %1, %cst {dimension_numbers = #tpu.dot_dimension_numbers<[1], [0], [0], [1], [0, 0, 1, 1], [], []>} : vector<8x256xbf16>, vector<256x128xbf16>, vector<8x128xf32> -> vector<8x128xf32>
    %c0_3 = arith.constant 0 : index
    %c0_4 = arith.constant 0 : index
    %3 = vector.load %arg3[%c0_3, %c0_4] : memref<1x128xf32, #tpu.memory_space<vmem>>, vector<1x128xf32>
    %4 = vector.broadcast %3 : vector<1x128xf32> to vector<8x128xf32>
    %5 = arith.addf %2, %4 : vector<8x128xf32>
    %6 = arith.truncf %5 : vector<8x128xf32> to vector<8x128xbf16>
    %c0_5 = arith.constant 0 : index
    %c0_6 = arith.constant 0 : index
    %7 = vector.load %arg4[%c0_5, %c0_6] : memref<128x128xbf16, #tpu.memory_space<vmem>>, vector<128x128xbf16>
    %cst_7 = arith.constant dense<0.000000e+00> : vector<8x128xf32>
    %8 = tpu.matmul %6, %7, %cst_7 {dimension_numbers = #tpu.dot_dimension_numbers<[1], [0], [0], [1], [0, 0, 1, 1], [], []>} : vector<8x128xbf16>, vector<128x128xbf16>, vector<8x128xf32> -> vector<8x128xf32>
    %c0_8 = arith.constant 0 : index
    %c0_9 = arith.constant 0 : index
    %9 = vector.load %arg5[%c0_8, %c0_9] : memref<1x128xf32, #tpu.memory_space<vmem>>, vector<1x128xf32>
    %10 = vector.broadcast %9 : vector<1x128xf32> to vector<8x128xf32>
    %11 = arith.addf %8, %10 : vector<8x128xf32>
    %cst_10 = arith.constant 5.000000e-01 : f32
    %12 = vector.broadcast %cst_10 : f32 to vector<8x128xf32>
    %13 = arith.mulf %12, %11 : vector<8x128xf32>
    %cst_11 = arith.constant 0.707106769 : f32
    %14 = vector.broadcast %cst_11 : f32 to vector<8x128xf32>
    %15 = arith.mulf %11, %14 : vector<8x128xf32>
    %16 = math.erf %15 : vector<8x128xf32>
    %cst_12 = arith.constant 1.000000e+00 : f32
    %17 = vector.broadcast %cst_12 : f32 to vector<8x128xf32>
    %18 = arith.addf %17, %16 : vector<8x128xf32>
    %19 = arith.mulf %13, %18 : vector<8x128xf32>
    %20 = arith.truncf %19 : vector<8x128xf32> to vector<8x128xbf16>
    %c0_13 = arith.constant 0 : index
    %c0_14 = arith.constant 0 : index
    %21 = vector.load %arg6[%c0_13, %c0_14] : memref<128x128xbf16, #tpu.memory_space<vmem>>, vector<128x128xbf16>
    %cst_15 = arith.constant dense<0.000000e+00> : vector<8x128xf32>
    %22 = tpu.matmul %20, %21, %cst_15 {dimension_numbers = #tpu.dot_dimension_numbers<[1], [0], [0], [1], [0, 0, 1, 1], [], []>} : vector<8x128xbf16>, vector<128x128xbf16>, vector<8x128xf32> -> vector<8x128xf32>
    %c0_16 = arith.constant 0 : index
    %c0_17 = arith.constant 0 : index
    %23 = vector.load %arg7[%c0_16, %c0_17] : memref<1x128xf32, #tpu.memory_space<vmem>>, vector<1x128xf32>
    %24 = vector.broadcast %23 : vector<1x128xf32> to vector<8x128xf32>
    %25 = arith.addf %22, %24 : vector<8x128xf32>
    %26 = tpu.iota {dimensions = array<i32: 1>} : vector<1x128xi32>
    %c32_i32 = arith.constant 32 : i32
    %27 = vector.broadcast %c32_i32 : i32 to vector<1x128xi32>
    %28 = arith.cmpi slt, %26, %27 : vector<1x128xi32>
    %29 = arith.extui %28 : vector<1x128xi1> to vector<1x128xi32>
    %30 = arith.sitofp %29 : vector<1x128xi32> to vector<1x128xf32>
    %31 = vector.broadcast %30 : vector<1x128xf32> to vector<8x128xf32>
    %32 = arith.mulf %25, %31 : vector<8x128xf32>
    %cst_18 = arith.constant dense<0.000000e+00> : vector<8xf32>
    %33 = vector.multi_reduction <add>, %32, %cst_18 [1] : vector<8x128xf32> to vector<8xf32>
    %34 = vector.shape_cast %33 : vector<8xf32> to vector<8x1xf32>
    %cst_19 = arith.constant 3.125000e-02 : f32
    %35 = vector.broadcast %cst_19 : f32 to vector<8x1xf32>
    %36 = arith.mulf %34, %35 : vector<8x1xf32>
    %37 = vector.broadcast %36 : vector<8x1xf32> to vector<8x128xf32>
    %38 = arith.subf %25, %37 : vector<8x128xf32>
    %39 = vector.broadcast %30 : vector<1x128xf32> to vector<8x128xf32>
    %40 = arith.mulf %38, %39 : vector<8x128xf32>
    %41 = arith.mulf %40, %40 : vector<8x128xf32>
    %cst_20 = arith.constant dense<0.000000e+00> : vector<8xf32>
    %42 = vector.multi_reduction <add>, %41, %cst_20 [1] : vector<8x128xf32> to vector<8xf32>
    %43 = vector.shape_cast %42 : vector<8xf32> to vector<8x1xf32>
    %cst_21 = arith.constant 3.125000e-02 : f32
    %44 = vector.broadcast %cst_21 : f32 to vector<8x1xf32>
    %45 = arith.mulf %43, %44 : vector<8x1xf32>
    %cst_22 = arith.constant 9.99999974E-6 : f32
    %46 = vector.broadcast %cst_22 : f32 to vector<8x1xf32>
    %47 = arith.addf %45, %46 : vector<8x1xf32>
    %48 = math.rsqrt %47 : vector<8x1xf32>
    %49 = vector.broadcast %48 : vector<8x1xf32> to vector<8x128xf32>
    %50 = arith.mulf %40, %49 : vector<8x128xf32>
    %c0_23 = arith.constant 0 : index
    %c0_24 = arith.constant 0 : index
    %51 = vector.load %arg8[%c0_23, %c0_24] : memref<1x128xf32, #tpu.memory_space<vmem>>, vector<1x128xf32>
    %52 = vector.broadcast %51 : vector<1x128xf32> to vector<8x128xf32>
    %53 = arith.mulf %50, %52 : vector<8x128xf32>
    %c0_25 = arith.constant 0 : index
    %c0_26 = arith.constant 0 : index
    %54 = vector.load %arg9[%c0_25, %c0_26] : memref<1x128xf32, #tpu.memory_space<vmem>>, vector<1x128xf32>
    %55 = vector.broadcast %54 : vector<1x128xf32> to vector<8x128xf32>
    %56 = arith.addf %53, %55 : vector<8x128xf32>
    %c0_27 = arith.constant 0 : index
    %c0_28 = arith.constant 0 : index
    %57 = vector.load %arg10[%c0_27, %c0_28] : memref<8x128xf32, #tpu.memory_space<vmem>>, vector<8x128xf32>
    tpu.vector_store %arg10[%c0_27, %c0_28], %56 {strides = array<i32>} : memref<8x128xf32, #tpu.memory_space<vmem>>, vector<8x128xf32>,
    return
  }
  func.func @transform_0(%arg0: i32) -> (i32, i32) {
    %c0_i32 = arith.constant 0 : i32
    %c0_i32_0 = arith.constant 0 : i32
    return %arg0, %c0_i32 : i32, i32
  }
  func.func @transform_1(%arg0: i32) -> (i32, i32) {
    %c0_i32 = arith.constant 0 : i32
    %c0_i32_0 = arith.constant 0 : i32
    %c0_i32_1 = arith.constant 0 : i32
    return %c0_i32, %c0_i32_0 : i32, i32
  }
  func.func @transform_2(%arg0: i32) -> (i32, i32) {
    %c0_i32 = arith.constant 0 : i32
    %c0_i32_0 = arith.constant 0 : i32
    %c0_i32_1 = arith.constant 0 : i32
    return %c0_i32, %c0_i32_0 : i32, i32
  }
  func.func @transform_3(%arg0: i32) -> (i32, i32) {
    %c0_i32 = arith.constant 0 : i32
    %c0_i32_0 = arith.constant 0 : i32
    %c0_i32_1 = arith.constant 0 : i32
    return %c0_i32, %c0_i32_0 : i32, i32
  }
  func.func @transform_4(%arg0: i32) -> (i32, i32) {
    %c0_i32 = arith.constant 0 : i32
    %c0_i32_0 = arith.constant 0 : i32
    %c0_i32_1 = arith.constant 0 : i32
    return %c0_i32, %c0_i32_0 : i32, i32
  }
  func.func @transform_5(%arg0: i32) -> (i32, i32) {
    %c0_i32 = arith.constant 0 : i32
    %c0_i32_0 = arith.constant 0 : i32
    %c0_i32_1 = arith.constant 0 : i32
    return %c0_i32, %c0_i32_0 : i32, i32
  }
  func.func @transform_6(%arg0: i32) -> (i32, i32) {
    %c0_i32 = arith.constant 0 : i32
    %c0_i32_0 = arith.constant 0 : i32
    %c0_i32_1 = arith.constant 0 : i32
    return %c0_i32, %c0_i32_0 : i32, i32
  }
  func.func @transform_7(%arg0: i32) -> (i32, i32) {
    %c0_i32 = arith.constant 0 : i32
    %c0_i32_0 = arith.constant 0 : i32
    %c0_i32_1 = arith.constant 0 : i32
    return %c0_i32, %c0_i32_0 : i32, i32
  }
  func.func @transform_8(%arg0: i32) -> (i32, i32) {
    %c0_i32 = arith.constant 0 : i32
    %c0_i32_0 = arith.constant 0 : i32
    %c0_i32_1 = arith.constant 0 : i32
    return %c0_i32, %c0_i32_0 : i32, i32
  }
  func.func @transform_9(%arg0: i32) -> (i32, i32) {
    %c0_i32 = arith.constant 0 : i32
    %c0_i32_0 = arith.constant 0 : i32
    return %arg0, %c0_i32 : i32, i32
  }
}

module attributes {stable_mosaic.version = 11 : i64} {
  func.func @_radio_encoder_kernel(%arg0: i32, %arg1: memref<8x256xbf16, #tpu.memory_space<vmem>>, %arg2: memref<256x128xbf16, #tpu.memory_space<vmem>>, %arg3: memref<1x128xf32, #tpu.memory_space<vmem>>, %arg4: memref<128x128xbf16, #tpu.memory_space<vmem>>, %arg5: memref<1x128xf32, #tpu.memory_space<vmem>>, %arg6: memref<128x128xbf16, #tpu.memory_space<vmem>>, %arg7: memref<1x128xf32, #tpu.memory_space<vmem>>, %arg8: memref<1x128xf32, #tpu.memory_space<vmem>>, %arg9: memref<1x128xf32, #tpu.memory_space<vmem>>, %arg10: memref<8x128xf32, #tpu.memory_space<vmem>>) attributes {dimension_semantics = [#tpu.dimension_semantics<parallel>], iteration_bounds = array<i64: 1>, scalar_prefetch = 0 : i64, scratch_operands = 0 : i64, tpu.core_type = #tpu.core_type<tc>, window_params = [{transform_indices = @transform_0, window_bounds = array<i64: 8, 256>}, {pipeline_mode = #tpu.pipeline_mode<synchronous>, transform_indices = @transform_1, window_bounds = array<i64: 256, 128>}, {pipeline_mode = #tpu.pipeline_mode<synchronous>, transform_indices = @transform_2, window_bounds = array<i64: 1, 128>}, {pipeline_mode = #tpu.pipeline_mode<synchronous>, transform_indices = @transform_3, window_bounds = array<i64: 128, 128>}, {pipeline_mode = #tpu.pipeline_mode<synchronous>, transform_indices = @transform_4, window_bounds = array<i64: 1, 128>}, {pipeline_mode = #tpu.pipeline_mode<synchronous>, transform_indices = @transform_5, window_bounds = array<i64: 128, 128>}, {pipeline_mode = #tpu.pipeline_mode<synchronous>, transform_indices = @transform_6, window_bounds = array<i64: 1, 128>}, {pipeline_mode = #tpu.pipeline_mode<synchronous>, transform_indices = @transform_7, window_bounds = array<i64: 1, 128>}, {pipeline_mode = #tpu.pipeline_mode<synchronous>, transform_indices = @transform_8, window_bounds = array<i64: 1, 128>}, {transform_indices = @transform_9, window_bounds = array<i64: 8, 128>}]} {
    %c0 = arith.constant 0 : index
    %c0_0 = arith.constant 0 : index
    %0 = vector.load %arg1[%c0, %c0_0] : memref<8x256xbf16, #tpu.memory_space<vmem>>, vector<8x256xbf16>
    %c0_1 = arith.constant 0 : index
    %c0_2 = arith.constant 0 : index
    %1 = vector.load %arg2[%c0_1, %c0_2] : memref<256x128xbf16, #tpu.memory_space<vmem>>, vector<256x128xbf16>
    %cst = arith.constant dense<0.000000e+00> : vector<8x128xf32>
    %2 = tpu.matmul %0, %1, %cst {dimension_numbers = #tpu.dot_dimension_numbers<[1], [0], [0], [1], [0, 0, 1, 1], [], []>} : vector<8x256xbf16>, vector<256x128xbf16>, vector<8x128xf32> -> vector<8x128xf32>
    %c0_3 = arith.constant 0 : index
    %c0_4 = arith.constant 0 : index
    %3 = vector.load %arg3[%c0_3, %c0_4] : memref<1x128xf32, #tpu.memory_space<vmem>>, vector<1x128xf32>
    %4 = vector.broadcast %3 : vector<1x128xf32> to vector<8x128xf32>
    %5 = arith.addf %2, %4 : vector<8x128xf32>
    %6 = arith.truncf %5 : vector<8x128xf32> to vector<8x128xbf16>
    %c0_5 = arith.constant 0 : index
    %c0_6 = arith.constant 0 : index
    %7 = vector.load %arg4[%c0_5, %c0_6] : memref<128x128xbf16, #tpu.memory_space<vmem>>, vector<128x128xbf16>
    %cst_7 = arith.constant dense<0.000000e+00> : vector<8x128xf32>
    %8 = tpu.matmul %6, %7, %cst_7 {dimension_numbers = #tpu.dot_dimension_numbers<[1], [0], [0], [1], [0, 0, 1, 1], [], []>} : vector<8x128xbf16>, vector<128x128xbf16>, vector<8x128xf32> -> vector<8x128xf32>
    %c0_8 = arith.constant 0 : index
    %c0_9 = arith.constant 0 : index
    %9 = vector.load %arg5[%c0_8, %c0_9] : memref<1x128xf32, #tpu.memory_space<vmem>>, vector<1x128xf32>
    %10 = vector.broadcast %9 : vector<1x128xf32> to vector<8x128xf32>
    %11 = arith.addf %8, %10 : vector<8x128xf32>
    %cst_10 = arith.constant 5.000000e-01 : f32
    %12 = vector.broadcast %cst_10 : f32 to vector<8x128xf32>
    %13 = arith.mulf %12, %11 : vector<8x128xf32>
    %cst_11 = arith.constant 0.707106769 : f32
    %14 = vector.broadcast %cst_11 : f32 to vector<8x128xf32>
    %15 = arith.mulf %11, %14 : vector<8x128xf32>
    %16 = math.erf %15 : vector<8x128xf32>
    %cst_12 = arith.constant 1.000000e+00 : f32
    %17 = vector.broadcast %cst_12 : f32 to vector<8x128xf32>
    %18 = arith.addf %17, %16 : vector<8x128xf32>
    %19 = arith.mulf %13, %18 : vector<8x128xf32>
    %20 = arith.truncf %19 : vector<8x128xf32> to vector<8x128xbf16>
    %c0_13 = arith.constant 0 : index
    %c0_14 = arith.constant 0 : index
    %21 = vector.load %arg6[%c0_13, %c0_14] : memref<128x128xbf16, #tpu.memory_space<vmem>>, vector<128x128xbf16>
    %cst_15 = arith.constant dense<0.000000e+00> : vector<8x128xf32>
    %22 = tpu.matmul %20, %21, %cst_15 {dimension_numbers = #tpu.dot_dimension_numbers<[1], [0], [0], [1], [0, 0, 1, 1], [], []>} : vector<8x128xbf16>, vector<128x128xbf16>, vector<8x128xf32> -> vector<8x128xf32>
    %c0_16 = arith.constant 0 : index
    %c0_17 = arith.constant 0 : index
    %23 = vector.load %arg7[%c0_16, %c0_17] : memref<1x128xf32, #tpu.memory_space<vmem>>, vector<1x128xf32>
    %24 = vector.broadcast %23 : vector<1x128xf32> to vector<8x128xf32>
    %25 = arith.addf %22, %24 : vector<8x128xf32>
    %26 = tpu.iota {dimensions = array<i32: 1>} : vector<1x128xi32>
    %c32_i32 = arith.constant 32 : i32
    %27 = vector.broadcast %c32_i32 : i32 to vector<1x128xi32>
    %28 = arith.cmpi slt, %26, %27 : vector<1x128xi32>
    %29 = arith.extui %28 : vector<1x128xi1> to vector<1x128xi32>
    %30 = arith.sitofp %29 : vector<1x128xi32> to vector<1x128xf32>
    %31 = vector.broadcast %30 : vector<1x128xf32> to vector<8x128xf32>
    %32 = arith.mulf %25, %31 : vector<8x128xf32>
    %cst_18 = arith.constant dense<0.000000e+00> : vector<8xf32>
    %33 = vector.multi_reduction <add>, %32, %cst_18 [1] : vector<8x128xf32> to vector<8xf32>
    %34 = vector.shape_cast %33 : vector<8xf32> to vector<8x1xf32>
    %cst_19 = arith.constant 3.125000e-02 : f32
    %35 = vector.broadcast %cst_19 : f32 to vector<8x1xf32>
    %36 = arith.mulf %34, %35 : vector<8x1xf32>
    %37 = vector.broadcast %36 : vector<8x1xf32> to vector<8x128xf32>
    %38 = arith.subf %25, %37 : vector<8x128xf32>
    %39 = vector.broadcast %30 : vector<1x128xf32> to vector<8x128xf32>
    %40 = arith.mulf %38, %39 : vector<8x128xf32>
    %41 = arith.mulf %40, %40 : vector<8x128xf32>
    %cst_20 = arith.constant dense<0.000000e+00> : vector<8xf32>
    %42 = vector.multi_reduction <add>, %41, %cst_20 [1] : vector<8x128xf32> to vector<8xf32>
    %43 = vector.shape_cast %42 : vector<8xf32> to vector<8x1xf32>
    %cst_21 = arith.constant 3.125000e-02 : f32
    %44 = vector.broadcast %cst_21 : f32 to vector<8x1xf32>
    %45 = arith.mulf %43, %44 : vector<8x1xf32>
    %cst_22 = arith.constant 9.99999974E-6 : f32
    %46 = vector.broadcast %cst_22 : f32 to vector<8x1xf32>
    %47 = arith.addf %45, %46 : vector<8x1xf32>
    %48 = math.rsqrt %47 : vector<8x1xf32>
    %49 = vector.broadcast %48 : vector<8x1xf32> to vector<8x128xf32>
    %50 = arith.mulf %40, %49 : vector<8x128xf32>
    %c0_23 = arith.constant 0 : index
    %c0_24 = arith.constant 0 : index
    %51 = vector.load %arg8[%c0_23, %c0_24] : memref<1x128xf32, #tpu.memory_space<vmem>>, vector<1x128xf32>
    %52 = vector.broadcast %51 : vector<1x128xf32> to vector<8x128xf32>
    %53 = arith.mulf %50, %52 : vector<8x128xf32>
    %c0_25 = arith.constant 0 : index
    %c0_26 = arith.constant 0 : index
    %54 = vector.load %arg9[%c0_25, %c0_26] : memref<1x128xf32, #tpu.memory_space<vmem>>, vector<1x128xf32>
    %55 = vector.broadcast %54 : vector<1x128xf32> to vector<8x128xf32>
    %56 = arith.addf %53, %55 : vector<8x128xf32>
    %c0_27 = arith.constant 0 : index
    %c0_28 = arith.constant 0 : index
    %57 = vector.load %arg10[%c0_27, %c0_28] : memref<8x128xf32, #tpu.memory_space<vmem>>, vector<8x128xf32>
    tpu.vector_store %arg10[%c0_27, %c0_28], %56 {strides = array<i32>} : memref<8x128xf32, #tpu.memory_space<vmem>>, vector<8x128xf32>,
    return
  }
  func.func @transform_0(%arg0: i32) -> (i32, i32) {
    %c0_i32 = arith.constant 0 : i32
    %c0_i32_0 = arith.constant 0 : i32
    return %arg0, %c0_i32 : i32, i32
  }
  func.func @transform_1(%arg0: i32) -> (i32, i32) {
    %c0_i32 = arith.constant 0 : i32
    %c0_i32_0 = arith.constant 0 : i32
    %c0_i32_1 = arith.constant 0 : i32
    return %c0_i32, %c0_i32_0 : i32, i32
  }
  func.func @transform_2(%arg0: i32) -> (i32, i32) {
    %c0_i32 = arith.constant 0 : i32
    %c0_i32_0 = arith.constant 0 : i32
    %c0_i32_1 = arith.constant 0 : i32
    return %c0_i32, %c0_i32_0 : i32, i32
  }
  func.func @transform_3(%arg0: i32) -> (i32, i32) {
    %c0_i32 = arith.constant 0 : i32
    %c0_i32_0 = arith.constant 0 : i32
    %c0_i32_1 = arith.constant 0 : i32
    return %c0_i32, %c0_i32_0 : i32, i32
  }
  func.func @transform_4(%arg0: i32) -> (i32, i32) {
    %c0_i32 = arith.constant 0 : i32
    %c0_i32_0 = arith.constant 0 : i32
    %c0_i32_1 = arith.constant 0 : i32
    return %c0_i32, %c0_i32_0 : i32, i32
  }
  func.func @transform_5(%arg0: i32) -> (i32, i32) {
    %c0_i32 = arith.constant 0 : i32
    %c0_i32_0 = arith.constant 0 : i32
    %c0_i32_1 = arith.constant 0 : i32
    return %c0_i32, %c0_i32_0 : i32, i32
  }
  func.func @transform_6(%arg0: i32) -> (i32, i32) {
    %c0_i32 = arith.constant 0 : i32
    %c0_i32_0 = arith.constant 0 : i32
    %c0_i32_1 = arith.constant 0 : i32
    return %c0_i32, %c0_i32_0 : i32, i32
  }
  func.func @transform_7(%arg0: i32) -> (i32, i32) {
    %c0_i32 = arith.constant 0 : i32
    %c0_i32_0 = arith.constant 0 : i32
    %c0_i32_1 = arith.constant 0 : i32
    return %c0_i32, %c0_i32_0 : i32, i32
  }
  func.func @transform_8(%arg0: i32) -> (i32, i32) {
    %c0_i32 = arith.constant 0 : i32
    %c0_i32_0 = arith.constant 0 : i32
    %c0_i32_1 = arith.constant 0 : i32
    return %c0_i32, %c0_i32_0 : i32, i32
  }
  func.func @transform_9(%arg0: i32) -> (i32, i32) {
    %c0_i32 = arith.constant 0 : i32
    %c0_i32_0 = arith.constant 0 : i32
    return %arg0, %c0_i32 : i32, i32
  }
}

</mosaic_0001>

<bundles_post_ra>
// kernel: tpu_custom_call.1
= control target key start
LH: loop header
LB: loop body
LE: loop exit
PB: predicated region body
PF: predicated region fallthrough
CT: control target
= control target key end

     0   :  { %14 = vsyncpa [#allocation3], 0  ;;  %s943_s0 = inlined_call_operand.hbm [shape: bf16[8,256], index: 0, kind: input, shape index: {}]   ;;  %s944_s1 = inlined_call_operand.hbm [shape: bf16[256,128], index: 1, kind: input, shape index: {}]   ;;  %s945_s2 = inlined_call_operand.vmem [shape: f32[1,128], index: 2, kind: input, shape index: {}]   ;;  %s946_s3 = inlined_call_operand.hbm [shape: bf16[128,128], index: 3, kind: input, shape index: {}]   ;;  %s947_s4 = inlined_call_operand.vmem [shape: f32[1,128], index: 4, kind: input, shape index: {}]   ;;  %s948_s5 = inlined_call_operand.hbm [shape: bf16[128,128], index: 5, kind: input, shape index: {}]   ;;  %s949_s6 = inlined_call_operand.vmem [shape: f32[1,128], index: 6, kind: input, shape index: {}]   ;;  %s950_s7 = inlined_call_operand.vmem [shape: f32[1,128], index: 7, kind: input, shape index: {}]   ;;  %s951_s8 = inlined_call_operand.vmem [shape: f32[1,128], index: 8, kind: input, shape index: {}]   ;;  %s952_s9 = inlined_call_operand.hbm [shape: f32[8,128], index: 9, kind: output, shape index: {}]  }
   0x1   :  { %15 = vsyncpa [#allocation6], 0 }
   0x2   :  { %16 = vsyncpa [#allocation9], 0 }
   0x3   :  { %17 = vsyncpa [#allocation4], 0  ;;  %s826_s30 = smov [#allocation5]  }
   0x4   :  { %s33_s10 = sshll.u32 %s826_s30, 4  ;;  %s34_s10 = int_to_ptr.vmem [resolvable:$true] %s33_s10 }
   0x5   :  { %s726_s11 = scalar_lea.vmem %s34_s10, 2048  ;;  %p731_p1 = scmp.lt.s32.totalorder %s34_s10, %s34_s10 }
   0x6   :  { %p727_p0 = scmp.ne.s32.totalorder %s34_s10, %s726_s11  ;;  %p732_p2 = scmp.lt.s32.totalorder %s726_s11, %s726_s11 }
   0x8   :  { %p733_p3 = por %p732_p2, %p731_p1 }
   0xa   :  { %p734_p4 = pnand %p733_p3, %p727_p0 }
   0xc   :  { %737 = shalt.err (!%p734_p4)
}
   0xd   :  { %s827_s12 = smov 64   ;;  %s828_s13 = smov 4  }
   0xe   :  { %39 = dma.hbm_to_vmem [thread:$0]  %s944_s1, 2048, %s34_s10, [#allocation6], %s827_s12, %s827_s12, %s828_s13  }
   0xf   :  { %s829_s16 = smov [#allocation2]   ;;  %s830_s18 = smov [#allocation7]  }
  0x10   :  { %s24_s17 = sshll.u32 %s829_s16, 4  ;;  %s47_s19 = sshll.u32 %s830_s18, 4  ;;  %s25_s17 = int_to_ptr.vmem [resolvable:$true] %s24_s17  ;;  %s48_s19 = int_to_ptr.vmem [resolvable:$true] %s47_s19 }
  0x11   :  { %s746_s20 = scalar_lea.vmem %s25_s17, 128  ;;  %p751_p6 = scmp.lt.s32.totalorder %s25_s17, %s25_s17 }
  0x12   :  { %p747_p5 = scmp.ne.s32.totalorder %s25_s17, %s746_s20  ;;  %p752_p7 = scmp.lt.s32.totalorder %s746_s20, %s746_s20 }
  0x14   :  { %p753_p8 = por %p752_p7, %p751_p6 }
  0x16   :  { %p754_p9 = pnand %p753_p8, %p747_p5 }
  0x18   :  { %757 = shalt.err (!%p754_p9)
}
  0x19   :  { %27 = dma.hbm_to_vmem [thread:$0]  %s943_s0, 128, %s25_s17, [#allocation3]  }
  0x1a   :  { %s766_s23 = scalar_lea.vmem %s48_s19, 1024  ;;  %p771_p11 = scmp.lt.s32.totalorder %s48_s19, %s48_s19 }
  0x1b   :  { %p767_p10 = scmp.ne.s32.totalorder %s48_s19, %s766_s23  ;;  %p772_p12 = scmp.lt.s32.totalorder %s766_s23, %s766_s23 }
  0x1d   :  { %p773_p13 = por %p772_p12, %p771_p11 }
  0x1f   :  { %p774_p0 = pnand %p773_p13, %p767_p10 }
  0x21   :  { %777 = shalt.err (!%p774_p0)
}
  0x22   :  { %53 = dma.hbm_to_vmem [thread:$0]  %s946_s3, 1024, %s48_s19, [#allocation6], %s827_s12, %s827_s12, %s828_s13  }
  0x23   :  { %s831_s25 = smov [#allocation8]  }
  0x24   :  { %s61_s26 = sshll.u32 %s831_s25, 4  ;;  %s62_s26 = int_to_ptr.vmem [resolvable:$true] %s61_s26 }
  0x25   :  { %s786_s27 = scalar_lea.vmem %s62_s26, 1024  ;;  %p791_p2 = scmp.lt.s32.totalorder %s62_s26, %s62_s26 }
  0x26   :  { %p787_p1 = scmp.ne.s32.totalorder %s62_s26, %s786_s27  ;;  %p792_p3 = scmp.lt.s32.totalorder %s786_s27, %s786_s27 }
  0x28   :  { %p793_p4 = por %p792_p3, %p791_p2 }
  0x2a   :  { %p794_p5 = pnand %p793_p4, %p787_p1 }
  0x2c   :  { %797 = shalt.err (!%p794_p5)
}
  0x2d   :  { %67 = dma.hbm_to_vmem [thread:$0]  %s948_s5, 1024, %s62_s26, [#allocation9], %s827_s12, %s827_s12, %s828_s13  }
  0x2e   :  { %818 = dma.done.wait [#allocation3], 128  }
  0x2f   :  { %819 = vsyncadd [#allocation3], 4294967168 }
  0x30   :  { %820 = dma.done.wait [#allocation6], 3072  }
  0x31   :  { %821 = vsyncadd [#allocation6], 4294964224 }
  0x32   :  { %822 = dma.done.wait [#allocation9], 1024  }
  0x33   :  { %823 = vsyncadd [#allocation9], 4294966272  ;;  %v832_v0 = vmov 0.0   ;;  %v680_v1 = vld [vmem:[#allocation5 + $0x78] sm:$0xff]   ;;  %v682_v3 = vld [vmem:[#allocation5 + $0x70] sm:$0xff]   ;;  %vm833_vm0 = vmmov 0   ;;  %v499_v56 = vlaneseq }
  0x34   :  { %631 = vmatprep.subr.bf16.mxu1 %v832_v0  ;;  %v681_v2 = vld [vmem:[#allocation5 + $0x38] sm:$0xff]   ;;  %591 = vmatprep.subr.bf16.mxu0 %v680_v1  ;;  %v683_v4 = vld [vmem:[#allocation5 + $0x30] sm:$0xff]   ;;  %v684_v5 = vld [vmem:[#allocation5 + $0x68] sm:$0xff]   ;;  %s834_s13 = smov [#allocation10]  }
  0x35   :  { %592 = vmatpush3.bf16.msra.mxu0 %v681_v2  ;;  %v685_v6 = vld [vmem:[#allocation5 + $0x28] sm:$0xff]   ;;  %v686_v7 = vld [vmem:[#allocation5 + $0x60] sm:$0xff]   ;;  %v688_v9 = vld [vmem:[#allocation5 + $0x58] sm:$0xff]   ;;  %647 = vmatprep.mubr.msk.bf16.mxu1 %vm833_vm0, %v832_v0  ;;  %v500_v57 = vand.u32 127, %v499_v56  ;;  %s540_s14 = sshll.u32 %s834_s13, 4  ;;  %s541_s14 = int_to_ptr.vmem [resolvable:$true] %s540_s14 }
  0x36   :  { %593 = vmatprep.subr.bf16.mxu0 %v682_v3  ;;  %v687_v8 = vld [vmem:[#allocation5 + $0x20] sm:$0xff]   ;;  %v689_v10 = vld [vmem:[#allocation5 + $0x18] sm:$0xff]   ;;  %v690_v11 = vld [vmem:[#allocation5 + $0x50] sm:$0xff]   ;;  %s798_s15 = scalar_lea.vmem %s541_s14, 128  ;;  %p803_p7 = scmp.lt.s32.totalorder %s541_s14, %s541_s14 }
  0x37   :  { %v87_v12 = vld [vmem:[#allocation2] sm:$0xff]  ;;  %v691_v15 = vld [vmem:[#allocation5 + $0x10] sm:$0xff]   ;;  %v692_v16 = vld [vmem:[#allocation5 + $0x48] sm:$0xff]   ;;  %vm501_vm1 = vcmp.lt.s32.totalorder %v500_v57, 32  ;;  %p799_p6 = scmp.ne.s32.totalorder %s541_s14, %s798_s15  ;;  %p804_p8 = scmp.lt.s32.totalorder %s798_s15, %s798_s15 }
  0x38   :  { %v553_v13 = vcombine.high %v87_v12, %v87_v12  ;;  %v698_v14 = vld [vmem:[#allocation7 + $0x38] sm:$0xff]   ;;  %v699_v17 = vld [vmem:[#allocation7 + $0x30] sm:$0xff]   ;;  %v693_v18 = vld [vmem:[#allocation5 + $0x8] sm:$0xff]   ;;  %v552_v23 = vcombine.low %v87_v12, %v87_v12  ;;  %v588_v60 = vsel %vm501_vm1, 1.0, %v832_v0 }
  0x39   :  { %594 = vmatpush3.bf16.msra.mxu0 %v683_v4  ;;  %632 = vmatpush3.bf16.msra.mxu1 %v698_v14  ;;  %v694_v19 = vld [vmem:[#allocation5 + $0x40] sm:$0xff]   ;;  %v700_v20 = vld [vmem:[#allocation7 + $0x28] sm:$0xff]   ;;  %v702_v24 = vld [vmem:[#allocation7 + $0x18] sm:$0xff]   ;;  %p805_p9 = por %p804_p8, %p803_p7 }
  0x3a   :  { %595 = vmatprep.subr.bf16.mxu0 %v684_v5  ;;  %262 = vmatprep.mubr.bf16.mxu0 %v553_v13  ;;  %v695_v21 = vld [vmem:[#allocation5] sm:$0xff]   ;;  %v703_v25 = vld [vmem:[#allocation7 + $0x10] sm:$0xff]   ;;  %v704_v26 = vld [vmem:[#allocation7 + $0x8] sm:$0xff]  }
  0x3b   :  { %633 = vmatprep.subr.bf16.mxu1 %v832_v0  ;;  %v701_v22 = vld [vmem:[#allocation7 + $0x20] sm:$0xff]   ;;  %v706_v28 = vld [vmem:[#allocation8 + $0x38] sm:$0xff]   ;;  %v707_v29 = vld [vmem:[#allocation8 + $0x30] sm:$0xff]   ;;  %p806_p10 = pnand %p805_p9, %p799_p6 }
  0x3c   :  { %v705_v27 = vld [vmem:[#allocation7] sm:$0xff]   ;;  %v551_v31 = vld [vmem:[%s945_s2] ss:$0 sm:$0xff]  ;;  %v708_v38 = vld [vmem:[#allocation8 + $0x28] sm:$0xff]  }
  0x3d   :  { %596 = vmatpush3.bf16.msra.mxu0 %v685_v6  ;;  %634 = vmatpush3.bf16.msra.mxu1 %v699_v17  ;;  %v709_v39 = vld [vmem:[#allocation8 + $0x20] sm:$0xff]   ;;  %v710_v40 = vld [vmem:[#allocation8 + $0x18] sm:$0xff]   ;;  %v711_v41 = vld [vmem:[#allocation8 + $0x10] sm:$0xff]  }
  0x3e   :  { %597 = vmatprep.subr.bf16.mxu0 %v686_v7  ;;  %635 = vmatprep.subr.bf16.mxu1 %v832_v0  ;;  %v712_v42 = vld [vmem:[#allocation8 + $0x8] sm:$0xff]   ;;  %v713_v43 = vld [vmem:[#allocation8] sm:$0xff]   ;;  %v570_v44 = vld [vmem:[%s947_s4] ss:$0 sm:$0xff] }
  0x3f   :  { %v579_v58 = vld [vmem:[%s949_s6] ss:$0 sm:$0xff] }
  0x40   :  { %v590_v13 = vld [vmem:[%s951_s8] ss:$0 sm:$0xff] }
  0x41   :  { %598 = vmatpush3.bf16.msra.mxu0 %v687_v8  ;;  %636 = vmatpush3.bf16.msra.mxu1 %v700_v20 }
  0x42   :  { %599 = vmatprep.subr.bf16.mxu0 %v688_v9  ;;  %637 = vmatprep.subr.bf16.mxu1 %v832_v0 }
  0x45   :  { %600 = vmatpush3.bf16.msra.mxu0 %v689_v10  ;;  %638 = vmatpush3.bf16.msra.mxu1 %v701_v22 }
  0x46   :  { %601 = vmatprep.subr.bf16.mxu0 %v690_v11  ;;  %639 = vmatprep.subr.bf16.mxu1 %v832_v0 }
  0x49   :  { %602 = vmatpush3.bf16.msra.mxu0 %v691_v15  ;;  %640 = vmatpush3.bf16.msra.mxu1 %v702_v24 }
  0x4a   :  { %603 = vmatprep.subr.bf16.mxu0 %v692_v16  ;;  %641 = vmatprep.subr.bf16.mxu1 %v832_v0 }
  0x4d   :  { %604 = vmatpush3.bf16.msra.mxu0 %v693_v18  ;;  %642 = vmatpush3.bf16.msra.mxu1 %v703_v25 }
  0x4e   :  { %605 = vmatprep.subr.bf16.mxu0 %v694_v19  ;;  %643 = vmatprep.subr.bf16.mxu1 %v832_v0 }
  0x51   :  { %606 = vmatpush3.bf16.msra.mxu0 %v695_v21  ;;  %644 = vmatpush3.bf16.msra.mxu1 %v704_v26 }
  0x52   :  { %651 = vmatprep.subr.bf16.mxu0 %v832_v0  ;;  %645 = vmatprep.subr.bf16.mxu1 %v832_v0 }
  0x54   :  { %263 = vmatmul.mubr.bf16.vlgmr.msra.gmra.mxu0 %v552_v23 }
  0x55   :  { %646 = vmatpush3.bf16.msra.mxu1 %v705_v27  ;;  %667 = vmatprep.mubr.msk.bf16.mxu0 %vm833_vm0, %v832_v0 }
  0x56   :  { %652 = vmatpush3.bf16.msra.mxu0 %v706_v28 }
  0x57   :  { %653 = vmatprep.subr.bf16.mxu0 %v832_v0 }
  0x5a   :  { %654 = vmatpush3.bf16.msra.mxu0 %v707_v29 }
  0x5b   :  { %655 = vmatprep.subr.bf16.mxu0 %v832_v0 }
  0x5e   :  { %656 = vmatpush3.bf16.msra.mxu0 %v708_v38 }
  0x5f   :  { %657 = vmatprep.subr.bf16.mxu0 %v832_v0 }
  0x62   :  { %658 = vmatpush3.bf16.msra.mxu0 %v709_v39 }
  0x63   :  { %659 = vmatprep.subr.bf16.mxu0 %v832_v0 }
  0x66   :  { %660 = vmatpush3.bf16.msra.mxu0 %v710_v40 }
  0x67   :  { %661 = vmatprep.subr.bf16.mxu0 %v832_v0 }
  0x6a   :  { %662 = vmatpush3.bf16.msra.mxu0 %v711_v41 }
  0x6b   :  { %663 = vmatprep.subr.bf16.mxu0 %v832_v0 }
  0x6e   :  { %664 = vmatpush3.bf16.msra.mxu0 %v712_v42 }
  0x6f   :  { %665 = vmatprep.subr.bf16.mxu0 %v832_v0  ;;  %v589_v0 = vld [vmem:[%s950_s7] ss:$0 sm:$0xff] }
  0x72   :  { %666 = vmatpush3.bf16.msra.mxu0 %v713_v43 }
 0x114   :  { %v607_v30 = vpop.f32.mrf.mxu0 }
 0x116   :  { %v608_v32 = vpop.f32.mrf.mxu0 }
 0x117   :  { %v609_v33 = vadd.f32 %v608_v32, %v607_v30 }
 0x118   :  { %v610_v34 = vpop.f32.mrf.mxu0 }
 0x119   :  { %v265_v35 = vadd.f32 %v609_v33, %v551_v31 }
 0x11a   :  { %v611_v36 = vpop.f32.mrf.mxu0 }
 0x11b   :  { %v270_v37 = vpack.c.bf16 %v265_v35, %v265_v35 }
 0x11d   :  { %648 = vmatmul.mubr.bf16.vlgmr.msra.gmra.mxu1 %v270_v37 }
 0x1dd   :  { %v376_v45 = vpop.f32.mrf.mxu1 }
 0x1de   :  { %v377_v46 = vadd.f32 %v570_v44, %v376_v45 }
 0x1df   :  { %v649_v47 = vpop.f32.mrf.mxu1 }
 0x1e0   :  { %v383_v48 = vmul.f32 0.70710677, %v377_v46  ;;  %v382_v52 = vmul.f32 0.5, %v377_v46 }
 0x1e1   :  { %v379_v49 = vpop.f32.mrf.mxu1 }
 0x1e2   :  { %714 = verf.f32 %v383_v48 }
 0x1e3   :  { %v650_v50 = vpop.f32.mrf.mxu1 }
 0x1ef   :  { %v715_v51 = vpop.eup %714 }
 0x1f0   :  { %v385_v53 = vadd.f32 1.0, %v715_v51 }
 0x1f2   :  { %v386_v54 = vmul.f32 %v385_v53, %v382_v52 }
 0x1f4   :  { %v387_v55 = vpack.c.bf16 %v386_v54, %v386_v54 }
 0x1f6   :  { %668 = vmatmul.mubr.bf16.vlgmr.msra.gmra.mxu0 %v387_v55 }
 0x2b6   :  { %v493_v59 = vpop.f32.mrf.mxu0 }
 0x2b7   :  { %v494_v61 = vadd.f32 %v579_v58, %v493_v59 }
 0x2b8   :  { %v669_v62 = vpop.f32.mrf.mxu0 }
 0x2b9   :  { %v504_v63 = vmul.f32 %v588_v60, %v494_v61 }
 0x2ba   :  { %v496_v1 = vpop.f32.mrf.mxu0 }
 0x2bb   :  { %505 = vadd.xlane.f32.xlu0 %v504_v63 }
 0x2bc   :  { %v670_v2 = vpop.f32.mrf.mxu0 }
 0x344   :  { %v506_v3 = vpop.xlane.xlu0 %505 }
 0x345   :  { %v507_v4 = vmul.f32 0.03125, %v506_v3 }
 0x347   :  { %v508_v5 = vsub.f32 %v494_v61, %v507_v4 }
 0x349   :  { %v509_v6 = vmul.f32 %v588_v60, %v508_v5 }
 0x34b   :  { %v510_v7 = vmul.f32 %v509_v6, %v509_v6 }
 0x34d   :  { %511 = vadd.xlane.f32.xlu0 %v510_v7 }
 0x3d6   :  { %v512_v8 = vpop.xlane.xlu0 %511 }
 0x3d7   :  { %v513_v9 = vmul.f32 0.03125, %v512_v8 }
 0x3d9   :  { %v514_v10 = vadd.f32 1e-05, %v513_v9 }
 0x3db   :  { %716 = vrsqrt.f32 %v514_v10 }
 0x3e8   :  { %v717_v11 = vpop.eup %716 }
 0x3e9   :  { %v516_v12 = vmul.f32 %v717_v11, %v509_v6 }
 0x3eb   :  { %v524_v14 = vmul.f32 %v589_v0, %v516_v12 }
 0x3ed   :  { %v532_v15 = vadd.f32 %v590_v13, %v524_v14 }
 0x3ef   :  { %533 = vst [vmem:[#allocation10] sm:$0xff] %v532_v15 }
 0x3f0   :  { %809 = shalt.err (!%p806_p10)
}
 0x3f1   :  { %543 = dma.vmem_to_hbm [thread:$0]  %s541_s14, 128, %s952_s9, [#allocation4]  }
 0x3f2   :  { %824 = dma.done.wait [#allocation4], 128  }
 0x3f3   :  { %825 = vsyncadd [#allocation4], 4294967168 }
 0x3f4   :  { %547 = vsyncpa [#allocation3], 1 }
 0x3f5   :  { %548 = vsyncpa [#allocation6], 1 }
 0x3f6   :  { %549 = vsyncpa [#allocation9], 1 }
 0x3f7   :  { %550 = vsyncpa [#allocation4], 1 }

// kernel: tpu_custom_call.1
= control target key start
LH: loop header
LB: loop body
LE: loop exit
PB: predicated region body
PF: predicated region fallthrough
CT: control target
= control target key end

     0   :  { %14 = vsyncpa [#allocation3], 0  ;;  %s943_s0 = inlined_call_operand.hbm [shape: bf16[8,256], index: 0, kind: input, shape index: {}]   ;;  %s944_s1 = inlined_call_operand.hbm [shape: bf16[256,128], index: 1, kind: input, shape index: {}]   ;;  %s945_s2 = inlined_call_operand.vmem [shape: f32[1,128], index: 2, kind: input, shape index: {}]   ;;  %s946_s3 = inlined_call_operand.hbm [shape: bf16[128,128], index: 3, kind: input, shape index: {}]   ;;  %s947_s4 = inlined_call_operand.vmem [shape: f32[1,128], index: 4, kind: input, shape index: {}]   ;;  %s948_s5 = inlined_call_operand.hbm [shape: bf16[128,128], index: 5, kind: input, shape index: {}]   ;;  %s949_s6 = inlined_call_operand.vmem [shape: f32[1,128], index: 6, kind: input, shape index: {}]   ;;  %s950_s7 = inlined_call_operand.vmem [shape: f32[1,128], index: 7, kind: input, shape index: {}]   ;;  %s951_s8 = inlined_call_operand.vmem [shape: f32[1,128], index: 8, kind: input, shape index: {}]   ;;  %s952_s9 = inlined_call_operand.hbm [shape: f32[8,128], index: 9, kind: output, shape index: {}]  }
   0x1   :  { %15 = vsyncpa [#allocation6], 0 }
   0x2   :  { %16 = vsyncpa [#allocation9], 0 }
   0x3   :  { %17 = vsyncpa [#allocation4], 0  ;;  %s826_s30 = smov [#allocation5]  }
   0x4   :  { %s33_s10 = sshll.u32 %s826_s30, 4  ;;  %s34_s10 = int_to_ptr.vmem [resolvable:$true] %s33_s10 }
   0x5   :  { %s726_s11 = scalar_lea.vmem %s34_s10, 2048  ;;  %p731_p1 = scmp.lt.s32.totalorder %s34_s10, %s34_s10 }
   0x6   :  { %p727_p0 = scmp.ne.s32.totalorder %s34_s10, %s726_s11  ;;  %p732_p2 = scmp.lt.s32.totalorder %s726_s11, %s726_s11 }
   0x8   :  { %p733_p3 = por %p732_p2, %p731_p1 }
   0xa   :  { %p734_p4 = pnand %p733_p3, %p727_p0 }
   0xc   :  { %737 = shalt.err (!%p734_p4)
}
   0xd   :  { %s827_s12 = smov 64   ;;  %s828_s13 = smov 4  }
   0xe   :  { %39 = dma.hbm_to_vmem [thread:$0]  %s944_s1, 2048, %s34_s10, [#allocation6], %s827_s12, %s827_s12, %s828_s13  }
   0xf   :  { %s829_s16 = smov [#allocation2]   ;;  %s830_s18 = smov [#allocation7]  }
  0x10   :  { %s24_s17 = sshll.u32 %s829_s16, 4  ;;  %s47_s19 = sshll.u32 %s830_s18, 4  ;;  %s25_s17 = int_to_ptr.vmem [resolvable:$true] %s24_s17  ;;  %s48_s19 = int_to_ptr.vmem [resolvable:$true] %s47_s19 }
  0x11   :  { %s746_s20 = scalar_lea.vmem %s25_s17, 128  ;;  %p751_p6 = scmp.lt.s32.totalorder %s25_s17, %s25_s17 }
  0x12   :  { %p747_p5 = scmp.ne.s32.totalorder %s25_s17, %s746_s20  ;;  %p752_p7 = scmp.lt.s32.totalorder %s746_s20, %s746_s20 }
  0x14   :  { %p753_p8 = por %p752_p7, %p751_p6 }
  0x16   :  { %p754_p9 = pnand %p753_p8, %p747_p5 }
  0x18   :  { %757 = shalt.err (!%p754_p9)
}
  0x19   :  { %27 = dma.hbm_to_vmem [thread:$0]  %s943_s0, 128, %s25_s17, [#allocation3]  }
  0x1a   :  { %s766_s23 = scalar_lea.vmem %s48_s19, 1024  ;;  %p771_p11 = scmp.lt.s32.totalorder %s48_s19, %s48_s19 }
  0x1b   :  { %p767_p10 = scmp.ne.s32.totalorder %s48_s19, %s766_s23  ;;  %p772_p12 = scmp.lt.s32.totalorder %s766_s23, %s766_s23 }
  0x1d   :  { %p773_p13 = por %p772_p12, %p771_p11 }
  0x1f   :  { %p774_p0 = pnand %p773_p13, %p767_p10 }
  0x21   :  { %777 = shalt.err (!%p774_p0)
}
  0x22   :  { %53 = dma.hbm_to_vmem [thread:$0]  %s946_s3, 1024, %s48_s19, [#allocation6], %s827_s12, %s827_s12, %s828_s13  }
  0x23   :  { %s831_s25 = smov [#allocation8]  }
  0x24   :  { %s61_s26 = sshll.u32 %s831_s25, 4  ;;  %s62_s26 = int_to_ptr.vmem [resolvable:$true] %s61_s26 }
  0x25   :  { %s786_s27 = scalar_lea.vmem %s62_s26, 1024  ;;  %p791_p2 = scmp.lt.s32.totalorder %s62_s26, %s62_s26 }
  0x26   :  { %p787_p1 = scmp.ne.s32.totalorder %s62_s26, %s786_s27  ;;  %p792_p3 = scmp.lt.s32.totalorder %s786_s27, %s786_s27 }
  0x28   :  { %p793_p4 = por %p792_p3, %p791_p2 }
  0x2a   :  { %p794_p5 = pnand %p793_p4, %p787_p1 }
  0x2c   :  { %797 = shalt.err (!%p794_p5)
}
  0x2d   :  { %67 = dma.hbm_to_vmem [thread:$0]  %s948_s5, 1024, %s62_s26, [#allocation9], %s827_s12, %s827_s12, %s828_s13  }
  0x2e   :  { %818 = dma.done.wait [#allocation3], 128  }
  0x2f   :  { %819 = vsyncadd [#allocation3], 4294967168 }
  0x30   :  { %820 = dma.done.wait [#allocation6], 3072  }
  0x31   :  { %821 = vsyncadd [#allocation6], 4294964224 }
  0x32   :  { %822 = dma.done.wait [#allocation9], 1024  }
  0x33   :  { %823 = vsyncadd [#allocation9], 4294966272  ;;  %v832_v0 = vmov 0.0   ;;  %v680_v1 = vld [vmem:[#allocation5 + $0x78] sm:$0xff]   ;;  %v682_v3 = vld [vmem:[#allocation5 + $0x70] sm:$0xff]   ;;  %vm833_vm0 = vmmov 0   ;;  %v499_v56 = vlaneseq }
  0x34   :  { %631 = vmatprep.subr.bf16.mxu1 %v832_v0  ;;  %v681_v2 = vld [vmem:[#allocation5 + $0x38] sm:$0xff]   ;;  %591 = vmatprep.subr.bf16.mxu0 %v680_v1  ;;  %v683_v4 = vld [vmem:[#allocation5 + $0x30] sm:$0xff]   ;;  %v684_v5 = vld [vmem:[#allocation5 + $0x68] sm:$0xff]   ;;  %s834_s13 = smov [#allocation10]  }
  0x35   :  { %592 = vmatpush3.bf16.msra.mxu0 %v681_v2  ;;  %v685_v6 = vld [vmem:[#allocation5 + $0x28] sm:$0xff]   ;;  %v686_v7 = vld [vmem:[#allocation5 + $0x60] sm:$0xff]   ;;  %v688_v9 = vld [vmem:[#allocation5 + $0x58] sm:$0xff]   ;;  %647 = vmatprep.mubr.msk.bf16.mxu1 %vm833_vm0, %v832_v0  ;;  %v500_v57 = vand.u32 127, %v499_v56  ;;  %s540_s14 = sshll.u32 %s834_s13, 4  ;;  %s541_s14 = int_to_ptr.vmem [resolvable:$true] %s540_s14 }
  0x36   :  { %593 = vmatprep.subr.bf16.mxu0 %v682_v3  ;;  %v687_v8 = vld [vmem:[#allocation5 + $0x20] sm:$0xff]   ;;  %v689_v10 = vld [vmem:[#allocation5 + $0x18] sm:$0xff]   ;;  %v690_v11 = vld [vmem:[#allocation5 + $0x50] sm:$0xff]   ;;  %s798_s15 = scalar_lea.vmem %s541_s14, 128  ;;  %p803_p7 = scmp.lt.s32.totalorder %s541_s14, %s541_s14 }
  0x37   :  { %v87_v12 = vld [vmem:[#allocation2] sm:$0xff]  ;;  %v691_v15 = vld [vmem:[#allocation5 + $0x10] sm:$0xff]   ;;  %v692_v16 = vld [vmem:[#allocation5 + $0x48] sm:$0xff]   ;;  %vm501_vm1 = vcmp.lt.s32.totalorder %v500_v57, 32  ;;  %p799_p6 = scmp.ne.s32.totalorder %s541_s14, %s798_s15  ;;  %p804_p8 = scmp.lt.s32.totalorder %s798_s15, %s798_s15 }
  0x38   :  { %v553_v13 = vcombine.high %v87_v12, %v87_v12  ;;  %v698_v14 = vld [vmem:[#allocation7 + $0x38] sm:$0xff]   ;;  %v699_v17 = vld [vmem:[#allocation7 + $0x30] sm:$0xff]   ;;  %v693_v18 = vld [vmem:[#allocation5 + $0x8] sm:$0xff]   ;;  %v552_v23 = vcombine.low %v87_v12, %v87_v12  ;;  %v588_v60 = vsel %vm501_vm1, 1.0, %v832_v0 }
  0x39   :  { %594 = vmatpush3.bf16.msra.mxu0 %v683_v4  ;;  %632 = vmatpush3.bf16.msra.mxu1 %v698_v14  ;;  %v694_v19 = vld [vmem:[#allocation5 + $0x40] sm:$0xff]   ;;  %v700_v20 = vld [vmem:[#allocation7 + $0x28] sm:$0xff]   ;;  %v702_v24 = vld [vmem:[#allocation7 + $0x18] sm:$0xff]   ;;  %p805_p9 = por %p804_p8, %p803_p7 }
  0x3a   :  { %595 = vmatprep.subr.bf16.mxu0 %v684_v5  ;;  %262 = vmatprep.mubr.bf16.mxu0 %v553_v13  ;;  %v695_v21 = vld [vmem:[#allocation5] sm:$0xff]   ;;  %v703_v25 = vld [vmem:[#allocation7 + $0x10] sm:$0xff]   ;;  %v704_v26 = vld [vmem:[#allocation7 + $0x8] sm:$0xff]  }
  0x3b   :  { %633 = vmatprep.subr.bf16.mxu1 %v832_v0  ;;  %v701_v22 = vld [vmem:[#allocation7 + $0x20] sm:$0xff]   ;;  %v706_v28 = vld [vmem:[#allocation8 + $0x38] sm:$0xff]   ;;  %v707_v29 = vld [vmem:[#allocation8 + $0x30] sm:$0xff]   ;;  %p806_p10 = pnand %p805_p9, %p799_p6 }
  0x3c   :  { %v705_v27 = vld [vmem:[#allocation7] sm:$0xff]   ;;  %v551_v31 = vld [vmem:[%s945_s2] ss:$0 sm:$0xff]  ;;  %v708_v38 = vld [vmem:[#allocation8 + $0x28] sm:$0xff]  }
  0x3d   :  { %596 = vmatpush3.bf16.msra.mxu0 %v685_v6  ;;  %634 = vmatpush3.bf16.msra.mxu1 %v699_v17  ;;  %v709_v39 = vld [vmem:[#allocation8 + $0x20] sm:$0xff]   ;;  %v710_v40 = vld [vmem:[#allocation8 + $0x18] sm:$0xff]   ;;  %v711_v41 = vld [vmem:[#allocation8 + $0x10] sm:$0xff]  }
  0x3e   :  { %597 = vmatprep.subr.bf16.mxu0 %v686_v7  ;;  %635 = vmatprep.subr.bf16.mxu1 %v832_v0  ;;  %v712_v42 = vld [vmem:[#allocation8 + $0x8] sm:$0xff]   ;;  %v713_v43 = vld [vmem:[#allocation8] sm:$0xff]   ;;  %v570_v44 = vld [vmem:[%s947_s4] ss:$0 sm:$0xff] }
  0x3f   :  { %v579_v58 = vld [vmem:[%s949_s6] ss:$0 sm:$0xff] }
  0x40   :  { %v590_v13 = vld [vmem:[%s951_s8] ss:$0 sm:$0xff] }
  0x41   :  { %598 = vmatpush3.bf16.msra.mxu0 %v687_v8  ;;  %636 = vmatpush3.bf16.msra.mxu1 %v700_v20 }
  0x42   :  { %599 = vmatprep.subr.bf16.mxu0 %v688_v9  ;;  %637 = vmatprep.subr.bf16.mxu1 %v832_v0 }
  0x45   :  { %600 = vmatpush3.bf16.msra.mxu0 %v689_v10  ;;  %638 = vmatpush3.bf16.msra.mxu1 %v701_v22 }
  0x46   :  { %601 = vmatprep.subr.bf16.mxu0 %v690_v11  ;;  %639 = vmatprep.subr.bf16.mxu1 %v832_v0 }
  0x49   :  { %602 = vmatpush3.bf16.msra.mxu0 %v691_v15  ;;  %640 = vmatpush3.bf16.msra.mxu1 %v702_v24 }
  0x4a   :  { %603 = vmatprep.subr.bf16.mxu0 %v692_v16  ;;  %641 = vmatprep.subr.bf16.mxu1 %v832_v0 }
  0x4d   :  { %604 = vmatpush3.bf16.msra.mxu0 %v693_v18  ;;  %642 = vmatpush3.bf16.msra.mxu1 %v703_v25 }
  0x4e   :  { %605 = vmatprep.subr.bf16.mxu0 %v694_v19  ;;  %643 = vmatprep.subr.bf16.mxu1 %v832_v0 }
  0x51   :  { %606 = vmatpush3.bf16.msra.mxu0 %v695_v21  ;;  %644 = vmatpush3.bf16.msra.mxu1 %v704_v26 }
  0x52   :  { %651 = vmatprep.subr.bf16.mxu0 %v832_v0  ;;  %645 = vmatprep.subr.bf16.mxu1 %v832_v0 }
  0x54   :  { %263 = vmatmul.mubr.bf16.vlgmr.msra.gmra.mxu0 %v552_v23 }
  0x55   :  { %646 = vmatpush3.bf16.msra.mxu1 %v705_v27  ;;  %667 = vmatprep.mubr.msk.bf16.mxu0 %vm833_vm0, %v832_v0 }
  0x56   :  { %652 = vmatpush3.bf16.msra.mxu0 %v706_v28 }
  0x57   :  { %653 = vmatprep.subr.bf16.mxu0 %v832_v0 }
  0x5a   :  { %654 = vmatpush3.bf16.msra.mxu0 %v707_v29 }
  0x5b   :  { %655 = vmatprep.subr.bf16.mxu0 %v832_v0 }
  0x5e   :  { %656 = vmatpush3.bf16.msra.mxu0 %v708_v38 }
  0x5f   :  { %657 = vmatprep.subr.bf16.mxu0 %v832_v0 }
  0x62   :  { %658 = vmatpush3.bf16.msra.mxu0 %v709_v39 }
  0x63   :  { %659 = vmatprep.subr.bf16.mxu0 %v832_v0 }
  0x66   :  { %660 = vmatpush3.bf16.msra.mxu0 %v710_v40 }
  0x67   :  { %661 = vmatprep.subr.bf16.mxu0 %v832_v0 }
  0x6a   :  { %662 = vmatpush3.bf16.msra.mxu0 %v711_v41 }
  0x6b   :  { %663 = vmatprep.subr.bf16.mxu0 %v832_v0 }
  0x6e   :  { %664 = vmatpush3.bf16.msra.mxu0 %v712_v42 }
  0x6f   :  { %665 = vmatprep.subr.bf16.mxu0 %v832_v0  ;;  %v589_v0 = vld [vmem:[%s950_s7] ss:$0 sm:$0xff] }
  0x72   :  { %666 = vmatpush3.bf16.msra.mxu0 %v713_v43 }
 0x114   :  { %v607_v30 = vpop.f32.mrf.mxu0 }
 0x116   :  { %v608_v32 = vpop.f32.mrf.mxu0 }
 0x117   :  { %v609_v33 = vadd.f32 %v608_v32, %v607_v30 }
 0x118   :  { %v610_v34 = vpop.f32.mrf.mxu0 }
 0x119   :  { %v265_v35 = vadd.f32 %v609_v33, %v551_v31 }
 0x11a   :  { %v611_v36 = vpop.f32.mrf.mxu0 }
 0x11b   :  { %v270_v37 = vpack.c.bf16 %v265_v35, %v265_v35 }
 0x11d   :  { %648 = vmatmul.mubr.bf16.vlgmr.msra.gmra.mxu1 %v270_v37 }
 0x1dd   :  { %v376_v45 = vpop.f32.mrf.mxu1 }
 0x1de   :  { %v377_v46 = vadd.f32 %v570_v44, %v376_v45 }
 0x1df   :  { %v649_v47 = vpop.f32.mrf.mxu1 }
 0x1e0   :  { %v383_v48 = vmul.f32 0.70710677, %v377_v46  ;;  %v382_v52 = vmul.f32 0.5, %v377_v46 }
 0x1e1   :  { %v379_v49 = vpop.f32.mrf.mxu1 }
 0x1e2   :  { %714 = verf.f32 %v383_v48 }
 0x1e3   :  { %v650_v50 = vpop.f32.mrf.mxu1 }
 0x1ef   :  { %v715_v51 = vpop.eup %714 }
 0x1f0   :  { %v385_v53 = vadd.f32 1.0, %v715_v51 }
 0x1f2   :  { %v386_v54 = vmul.f32 %v385_v53, %v382_v52 }
 0x1f4   :  { %v387_v55 = vpack.c.bf16 %v386_v54, %v386_v54 }
 0x1f6   :  { %668 = vmatmul.mubr.bf16.vlgmr.msra.gmra.mxu0 %v387_v55 }
 0x2b6   :  { %v493_v59 = vpop.f32.mrf.mxu0 }
 0x2b7   :  { %v494_v61 = vadd.f32 %v579_v58, %v493_v59 }
 0x2b8   :  { %v669_v62 = vpop.f32.mrf.mxu0 }
 0x2b9   :  { %v504_v63 = vmul.f32 %v588_v60, %v494_v61 }
 0x2ba   :  { %v496_v1 = vpop.f32.mrf.mxu0 }
 0x2bb   :  { %505 = vadd.xlane.f32.xlu0 %v504_v63 }
 0x2bc   :  { %v670_v2 = vpop.f32.mrf.mxu0 }
 0x344   :  { %v506_v3 = vpop.xlane.xlu0 %505 }
 0x345   :  { %v507_v4 = vmul.f32 0.03125, %v506_v3 }
 0x347   :  { %v508_v5 = vsub.f32 %v494_v61, %v507_v4 }
 0x349   :  { %v509_v6 = vmul.f32 %v588_v60, %v508_v5 }
 0x34b   :  { %v510_v7 = vmul.f32 %v509_v6, %v509_v6 }
 0x34d   :  { %511 = vadd.xlane.f32.xlu0 %v510_v7 }
 0x3d6   :  { %v512_v8 = vpop.xlane.xlu0 %511 }
 0x3d7   :  { %v513_v9 = vmul.f32 0.03125, %v512_v8 }
 0x3d9   :  { %v514_v10 = vadd.f32 1e-05, %v513_v9 }
 0x3db   :  { %716 = vrsqrt.f32 %v514_v10 }
 0x3e8   :  { %v717_v11 = vpop.eup %716 }
 0x3e9   :  { %v516_v12 = vmul.f32 %v717_v11, %v509_v6 }
 0x3eb   :  { %v524_v14 = vmul.f32 %v589_v0, %v516_v12 }
 0x3ed   :  { %v532_v15 = vadd.f32 %v590_v13, %v524_v14 }
 0x3ef   :  { %533 = vst [vmem:[#allocation10] sm:$0xff] %v532_v15 }
 0x3f0   :  { %809 = shalt.err (!%p806_p10)
}
 0x3f1   :  { %543 = dma.vmem_to_hbm [thread:$0]  %s541_s14, 128, %s952_s9, [#allocation4]  }
 0x3f2   :  { %824 = dma.done.wait [#allocation4], 128  }
 0x3f3   :  { %825 = vsyncadd [#allocation4], 4294967168 }
 0x3f4   :  { %547 = vsyncpa [#allocation3], 1 }
 0x3f5   :  { %548 = vsyncpa [#allocation6], 1 }
 0x3f6   :  { %549 = vsyncpa [#allocation9], 1 }
 0x3f7   :  { %550 = vsyncpa [#allocation4], 1 }

</bundles_post_ra>
